<compile_context>
chip_gen: v6e
topology: v6e:2x2x1
jax: 0.10.0
libtpu: 0.0.40
codegen_flags: <defaults>
</compile_context>

<pallas_src>
import functools

import jax
import jax.numpy as jnp
from jax.experimental import pallas as pl
from jax.experimental.pallas import tpu as pltpu

LANES = 128
TILE_BYTES = 8 * 1024 * 1024     # HBM bytes per input per pipeline buffer
MAX_TILE_ROWS = 32768            # hard cap on rows per block (8 MiB for bf16)
ACC_ROWS = 8                     # single-vreg f32 accumulator: (8, 128)


def _round_up(x, m):
    return ((x + m - 1) // m) * m


def _mse_sum_kernel(p_ref, t_ref, o_ref, acc_ref, *,
                    tile_rows, rows, bpc, needs_mask):
    c = pl.program_id(0)          # "parallel" slice (megacore / dual-TC)
    i = pl.program_id(1)          # "arbitrary" reduction step within the slice

    @pl.when(i == 0)
    def _():
        acc_ref[...] = jnp.zeros_like(acc_ref)

    d = p_ref[...].astype(jnp.float32) - t_ref[...].astype(jnp.float32)
    sq = d * d                    # |d|**2 == d*d exactly for real floats

    def _accumulate(vals):
        # Fold the tile into a single (8, 128) vreg with elementwise adds (VPU only).
        acc_ref[...] += vals.reshape(tile_rows // ACC_ROWS, ACC_ROWS, LANES).sum(axis=0)

    if needs_mask:
        step = c * bpc + i
        is_edge = (step + 1) * tile_rows > rows   # partial edge or clamped duplicate

        @pl.when(jnp.logical_not(is_edge))
        def _():                                   # unmasked fast path (bulk of steps)
            _accumulate(sq)

        @pl.when(is_edge)
        def _():                                   # edge block: zero rows past `rows`
            row0 = step * tile_rows
            row_ids = row0 + jax.lax.broadcasted_iota(jnp.int32, sq.shape, 0)
            _accumulate(jnp.where(row_ids < rows, sq, 0.0))
    else:
        _accumulate(sq)

    @pl.when(i == pl.num_programs(1) - 1)
    def _():
        o_ref[0, 0] = jnp.sum(acc_ref[...])        # single-vreg reduce -> SMEM scalar


def _mse_sum_2d(p2, t2, rows, itemsize, max_tile_rows=None):
    """Sum of (p - t)**2 over a (rows, 128) view, computed with the Pallas kernel."""
    sublane = {4: 8, 2: 16, 1: 32}.get(itemsize, 8)

    # Byte-budget tile: keep ~TILE_BYTES of HBM per input per buffer regardless of dtype.
    budget_rows = max(sublane, (TILE_BYTES // (LANES * itemsize)) // sublane * sublane)
    cap = MAX_TILE_ROWS if max_tile_rows is None else max_tile_rows
    budget_rows = min(budget_rows, _round_up(cap, sublane))
    tile_rows = min(budget_rows, _round_up(rows, sublane))   # multiple of sublane (>= 8)

    blocks_total = -(-rows // tile_rows)
    num_slices = 2 if blocks_total >= 2 else 1     # 2 TCs on v7x; near-neutral on 1-TC chips
    bpc = -(-blocks_total // num_slices)           # blocks per slice
    needs_mask = (num_slices * bpc * tile_rows) != rows

    def in_index_map(c, i):
        # Clamp so the last slice never indexes past the array; the re-read
        # duplicate block is fully zeroed by the in-kernel edge mask.
        return (jnp.minimum(c * bpc + i, blocks_total - 1), 0)

    kernel = functools.partial(
        _mse_sum_kernel,
        tile_rows=tile_rows, rows=rows, bpc=bpc, needs_mask=needs_mask,
    )

    tile_bytes = tile_rows * LANES * itemsize
    # 2 inputs x 2 pipeline buffers + small accumulator + headroom; <= 48 MiB (< v7x 64 MiB).
    vmem_limit = min(48 * 1024 * 1024,
                     max(32 * 1024 * 1024, 2 * 2 * tile_bytes + 4 * 1024 * 1024))

    partials = pl.pallas_call(
        kernel,
        out_shape=jax.ShapeDtypeStruct((num_slices, 1), jnp.float32),
        grid_spec=pltpu.PrefetchScalarGridSpec(
            num_scalar_prefetch=0,
            grid=(num_slices, bpc),
            in_specs=[
                pl.BlockSpec((tile_rows, LANES), in_index_map),
                pl.BlockSpec((tile_rows, LANES), in_index_map),
            ],
            out_specs=pl.BlockSpec((1, 1), lambda c, i: (c, 0),
                                   memory_space=pltpu.SMEM),
            scratch_shapes=[pltpu.VMEM((ACC_ROWS, LANES), jnp.float32)],
        ),
        compiler_params=pltpu.CompilerParams(
            dimension_semantics=("parallel", "arbitrary"),
            vmem_limit_bytes=vmem_limit,
        ),
        cost_estimate=pl.CostEstimate(
            flops=3 * rows * LANES,
            transcendentals=0,
            bytes_accessed=2 * rows * LANES * itemsize + 4 * num_slices,
        ),
    )(p2, t2)

    return jnp.sum(partials)


def custom_mse_loss(pred, target, reduction="sum", max_tile_rows=None):
    """Pallas TPU implementation of Custom_MSE_loss.forward."""
    assert pred.shape == target.shape, "pred/target must have identical shapes"
    n = pred.size
    out_dtype = jnp.promote_types(pred.dtype, target.dtype)
    if not jnp.issubdtype(out_dtype, jnp.floating):
        out_dtype = jnp.float32
    itemsize = max(jnp.dtype(pred.dtype).itemsize, jnp.dtype(target.dtype).itemsize)
    sublane = {4: 8, 2: 16, 1: 32}.get(itemsize, 8)

    p_flat = pred.reshape(-1)
    t_flat = target.reshape(-1)

    # Kernel runs on the 128-aligned prefix (zero-copy reshape when n % 128 == 0);
    # the tiny tail (< 128 elements) is handled with plain jnp -- no jnp.pad copy.
    n_main = (n // LANES) * LANES
    rows = n_main // LANES

    total = jnp.float32(0.0)
    if rows >= sublane:
        if n_main == n:
            p2 = p_flat.reshape(rows, LANES)
            t2 = t_flat.reshape(rows, LANES)
        else:
            p2 = p_flat[:n_main].reshape(rows, LANES)
            t2 = t_flat[:n_main].reshape(rows, LANES)
        total = total + _mse_sum_2d(p2, t2, rows, itemsize, max_tile_rows)
        tail_start = n_main
    else:
        tail_start = 0                     # too small for the kernel: do it all in jnp

    if tail_start != n:
        tp = p_flat[tail_start:].astype(jnp.float32)
        tt = t_flat[tail_start:].astype(jnp.float32)
        total = total + jnp.sum((tp - tt) ** 2)

    if reduction == "mean":
        total = total / jnp.float32(n)
    return total.astype(out_dtype)


if __name__ == "__main__":
    key = jax.random.PRNGKey(0)
    k1, k2, k3, k4, k5, k6 = jax.random.split(key, 6)

    # Primary: segmentation-style NCHW prediction map (single-block kernel path).
    pred = jax.random.normal(k1, (2, 4, 16, 16), dtype=jnp.float32)
    target = jax.random.normal(k2, (2, 4, 16, 16), dtype=jnp.float32)

    loss_sum = jax.block_until_ready(custom_mse_loss(pred, target, reduction="sum"))
    ref_sum = jnp.sum(jnp.abs(pred - target) ** 2)
    assert jnp.allclose(loss_sum, ref_sum, rtol=1e-5, atol=1e-5), (loss_sum, ref_sum)

    loss_mean = jax.block_until_ready(custom_mse_loss(pred, target, reduction="mean"))
    ref_mean = jnp.mean(jnp.abs(pred - target) ** 2)
    assert jnp.allclose(loss_mean, ref_mean, rtol=1e-5, atol=1e-5), (loss_mean, ref_mean)

    # Ragged element count (not a multiple of 128): exercises the jnp tail path.
    p2 = jax.random.normal(k3, (2, 3, 7, 5), dtype=jnp.float32)
    t2 = jax.random.normal(k4, (2, 3, 7, 5), dtype=jnp.float32)
    loss2 = jax.block_until_ready(custom_mse_loss(p2, t2, reduction="sum"))
    ref2 = jnp.sum(jnp.abs(p2 - t2) ** 2)
    assert jnp.allclose(loss2, ref2, rtol=1e-5, atol=1e-5), (loss2, ref2)

    # Multi-block case with a forced small tile: exercises the 2-slice parallel
    # split, the partial edge block and the clamped duplicate block (edge mask).
    p3 = jax.random.normal(k5, (1, 8, 260, 256), dtype=jnp.float32)
    t3 = jax.random.normal(k6, (1, 8, 260, 256), dtype=jnp.float32)
    loss3 = jax.block_until_ready(
        custom_mse_loss(p3, t3, reduction="sum", max_tile_rows=512))
    ref3 = jnp.sum(jnp.abs(p3 - t3) ** 2)
    assert jnp.allclose(loss3, ref3, rtol=1e-5, atol=1e-5), (loss3, ref3)

    # Same data through the default (large-tile) config as well.
    loss3b = jax.block_until_ready(custom_mse_loss(p3, t3, reduction="mean"))
    ref3b = jnp.mean(jnp.abs(p3 - t3) ** 2)
    assert jnp.allclose(loss3b, ref3b, rtol=1e-5, atol=1e-5), (loss3b, ref3b)

    print("KERNEL_OK")
</pallas_src>

<mosaic_0001>
module attributes {stable_mosaic.version = 11 : i64} {
  func.func @_mse_sum_kernel(%arg0: i32, %arg1: i32, %arg2: memref<16x128xf32, #tpu.memory_space<vmem>>, %arg3: memref<16x128xf32, #tpu.memory_space<vmem>>, %arg4: memref<1x1xf32, #tpu.memory_space<smem>>, %arg5: memref<8x128xf32, #tpu.memory_space<vmem>>) attributes {dimension_semantics = [#tpu.dimension_semantics<parallel>, #tpu.dimension_semantics<arbitrary>], iteration_bounds = array<i64: 1, 1>, scalar_prefetch = 0 : i64, scratch_operands = 1 : i64, tpu.core_type = #tpu.core_type<tc>, window_params = [{transform_indices = @transform_0, window_bounds = array<i64: 16, 128>}, {transform_indices = @transform_1, window_bounds = array<i64: 16, 128>}, {transform_indices = @transform_2, window_bounds = array<i64: 1, 1>}]} {
    %c0_i32 = arith.constant 0 : i32
    %0 = arith.cmpi eq, %arg1, %c0_i32 : i32
    %1 = arith.extui %0 : i1 to i32
    %c0_i32_0 = arith.constant 0 : i32
    %2 = arith.cmpi ne, %1, %c0_i32_0 : i32
    scf.if %2 {
      %cst_10 = arith.constant 0.000000e+00 : f32
      %15 = vector.broadcast %cst_10 : f32 to vector<8x128xf32>
      %c0_11 = arith.constant 0 : index
      %c0_12 = arith.constant 0 : index
      %16 = vector.load %arg5[%c0_11, %c0_12] : memref<8x128xf32, #tpu.memory_space<vmem>>, vector<8x128xf32>
      tpu.vector_store %arg5[%c0_11, %c0_12], %15 {strides = array<i32>} : memref<8x128xf32, #tpu.memory_space<vmem>>, vector<8x128xf32>,
    } else {
    }
    %c0 = arith.constant 0 : index
    %c0_1 = arith.constant 0 : index
    %3 = vector.load %arg2[%c0, %c0_1] : memref<16x128xf32, #tpu.memory_space<vmem>>, vector<16x128xf32>
    %c0_2 = arith.constant 0 : index
    %c0_3 = arith.constant 0 : index
    %4 = vector.load %arg3[%c0_2, %c0_3] : memref<16x128xf32, #tpu.memory_space<vmem>>, vector<16x128xf32>
    %5 = arith.subf %3, %4 : vector<16x128xf32>
    %6 = arith.mulf %5, %5 : vector<16x128xf32>
    %c0_4 = arith.constant 0 : index
    %c0_5 = arith.constant 0 : index
    %7 = vector.load %arg5[%c0_4, %c0_5] : memref<8x128xf32, #tpu.memory_space<vmem>>, vector<8x128xf32>
    %8 = vector.shape_cast %6 : vector<16x128xf32> to vector<2x8x128xf32>
    %cst = arith.constant dense<0.000000e+00> : vector<8x128xf32>
    %9 = vector.multi_reduction <add>, %8, %cst [0] : vector<2x8x128xf32> to vector<8x128xf32>
    %10 = arith.addf %7, %9 : vector<8x128xf32>
    %c0_6 = arith.constant 0 : index
    %c0_7 = arith.constant 0 : index
    %11 = vector.load %arg5[%c0_6, %c0_7] : memref<8x128xf32, #tpu.memory_space<vmem>>, vector<8x128xf32>
    tpu.vector_store %arg5[%c0_6, %c0_7], %10 {strides = array<i32>} : memref<8x128xf32, #tpu.memory_space<vmem>>, vector<8x128xf32>,
    %c0_i32_8 = arith.constant 0 : i32
    %12 = arith.cmpi eq, %arg1, %c0_i32_8 : i32
    %13 = arith.extui %12 : i1 to i32
    %c0_i32_9 = arith.constant 0 : i32
    %14 = arith.cmpi ne, %13, %c0_i32_9 : i32
    scf.if %14 {
      %c0_10 = arith.constant 0 : index
      %c0_11 = arith.constant 0 : index
      %15 = vector.load %arg5[%c0_10, %c0_11] : memref<8x128xf32, #tpu.memory_space<vmem>>, vector<8x128xf32>
      %16 = vector.shape_cast %15 : vector<8x128xf32> to vector<1x8x128xf32>
      %cst_12 = arith.constant dense<0.000000e+00> : vector<1xf32>
      %17 = vector.multi_reduction <add>, %16, %cst_12 [1, 2] : vector<1x8x128xf32> to vector<1xf32>
      %18 = vector.shape_cast %17 : vector<1xf32> to vector<1x1x1xf32>
      %19 = vector.extract %18[0, 0, 0] : f32 from vector<1x1x1xf32>
      %c0_13 = arith.constant 0 : index
      %c0_14 = arith.constant 0 : index
      %20 = memref.load %arg4[%c0_13, %c0_14] : memref<1x1xf32, #tpu.memory_space<smem>>
      memref.store %19, %arg4[%c0_13, %c0_14] : memref<1x1xf32, #tpu.memory_space<smem>>
    } else {
    }
    return
  }
  func.func @transform_0(%arg0: i32, %arg1: i32) -> (i32, i32) {
    %c1_i32 = arith.constant 1 : i32
    %0 = arith.muli %arg0, %c1_i32 : i32
    %1 = arith.addi %0, %arg1 : i32
    %c0_i32 = arith.constant 0 : i32
    %2 = arith.minsi %1, %c0_i32 : i32
    %c0_i32_0 = arith.constant 0 : i32
    %c0_i32_1 = arith.constant 0 : i32
    return %2, %c0_i32_0 : i32, i32
  }
  func.func @transform_1(%arg0: i32, %arg1: i32) -> (i32, i32) {
    %c1_i32 = arith.constant 1 : i32
    %0 = arith.muli %arg0, %c1_i32 : i32
    %1 = arith.addi %0, %arg1 : i32
    %c0_i32 = arith.constant 0 : i32
    %2 = arith.minsi %1, %c0_i32 : i32
    %c0_i32_0 = arith.constant 0 : i32
    %c0_i32_1 = arith.constant 0 : i32
    return %2, %c0_i32_0 : i32, i32
  }
  func.func @transform_2(%arg0: i32, %arg1: i32) -> (i32, i32) {
    %c0_i32 = arith.constant 0 : i32
    %c0_i32_0 = arith.constant 0 : i32
    return %arg0, %c0_i32 : i32, i32
  }
}

</mosaic_0001>

<bundles_post_ra>
// kernel: tpu_custom_call.1
= control target key start
LH: loop header
LB: loop body
LE: loop exit
PB: predicated region body
PF: predicated region fallthrough
CT: control target
= control target key end

     0   :  { %7 = vsyncpa [#allocation4], 0  ;;  %s201_s0 = inlined_call_operand.hbm [shape: f32[16,128], index: 0, kind: input, shape index: {}]   ;;  %s202_s1 = inlined_call_operand.hbm [shape: f32[16,128], index: 1, kind: input, shape index: {}]   ;;  %s203_s2 = inlined_call_operand.hbm [shape: f32[1,1], index: 2, kind: output, shape index: {}]  }
   0x1   :  { %8 = vsyncpa [#allocation7], 0 }
   0x2   :  { %9 = vsyncpa [#allocation5], 0  ;;  %s172_s9 = smov [#allocation3]  }
   0x3   :  { %s21_s10 = sshll.u32 %s172_s9, 4  ;;  %s22_s10 = int_to_ptr.vmem [resolvable:$true] %s21_s10 }
   0x4   :  { %s126_s11 = scalar_lea.vmem %s22_s10, 256  ;;  %p131_p1 = scmp.lt.s32.totalorder %s22_s10, %s22_s10 }
   0x5   :  { %p127_p0 = scmp.ne.s32.totalorder %s22_s10, %s126_s11  ;;  %p132_p2 = scmp.lt.s32.totalorder %s126_s11, %s126_s11 }
   0x7   :  { %p133_p3 = por %p132_p2, %p131_p1 }
   0x9   :  { %p134_p4 = pnand %p133_p3, %p127_p0 }
   0xb   :  { %137 = shalt.err (!%p134_p4)
}
   0xc   :  { %s173_s12 = smov 128   ;;  %s174_s13 = smov 8  }
   0xd   :  { %27 = dma.hbm_to_vmem [thread:$0]  %s201_s0, 256, %s22_s10, [#allocation4], %s173_s12, %s173_s12, %s174_s13  }
   0xe   :  { %s175_s16 = smov [#allocation6]  }
   0xf   :  { %s39_s17 = sshll.u32 %s175_s16, 4  ;;  %s40_s17 = int_to_ptr.vmem [resolvable:$true] %s39_s17 }
  0x10   :  { %s146_s18 = scalar_lea.vmem %s40_s17, 256  ;;  %p151_p6 = scmp.lt.s32.totalorder %s40_s17, %s40_s17 }
  0x11   :  { %p147_p5 = scmp.ne.s32.totalorder %s40_s17, %s146_s18  ;;  %p152_p7 = scmp.lt.s32.totalorder %s146_s18, %s146_s18 }
  0x13   :  { %p153_p8 = por %p152_p7, %p151_p6 }
  0x15   :  { %p154_p9 = pnand %p153_p8, %p147_p5 }
  0x17   :  { %157 = shalt.err (!%p154_p9)
}
  0x18   :  { %45 = dma.hbm_to_vmem [thread:$0]  %s202_s1, 256, %s40_s17, [#allocation7], %s173_s12, %s173_s12, %s174_s13  }
  0x19   :  { %166 = dma.done.wait [#allocation4], 256  }
  0x1a   :  { %167 = vsyncadd [#allocation4], 4294967040 }
  0x1b   :  { %168 = dma.done.wait [#allocation7], 256  }
  0x1c   :  { %169 = vsyncadd [#allocation7], 4294967040  ;;  %v65_v0 = vld [vmem:[#allocation3] sm:$0xff]  ;;  %v66_v1 = vld [vmem:[#allocation3 + $0x8] sm:$0xff]  ;;  %s176_s1 = smov [#allocation8]  }
  0x1d   :  { %v67_v2 = vld [vmem:[#allocation6] sm:$0xff]  ;;  %v68_v3 = vld [vmem:[#allocation6 + $0x8] sm:$0xff] }
  0x1e   :  { %v69_v4 = vsub.f32 %v65_v0, %v67_v2  ;;  %v70_v5 = vsub.f32 %v66_v1, %v68_v3 }
  0x20   :  { %v71_v6 = vmul.f32 %v69_v4, %v69_v4  ;;  %v72_v7 = vmul.f32 %v70_v5, %v70_v5 }
  0x22   :  { %v74_v8 = vadd.f32 %v72_v7, %v71_v6 }
  0x24   :  { %81 = vadd.xlane.f32.xlu0 %v74_v8 }
  0xad   :  { %v82_v9 = vpop.xlane.xlu0 %81 }
  0xae   :  { %v83_v10 = vrot.slane %v82_v9, 4 }
  0xb0   :  { %v84_v11 = vadd.f32 %v83_v10, %v82_v9 }
  0xb2   :  { %v85_v12 = vrot.slane %v84_v11, 2 }
  0xb4   :  { %v86_v13 = vadd.f32 %v85_v12, %v84_v11 }
  0xb6   :  { %v87_v14 = vrot.slane %v86_v13, 1 }
  0xb8   :  { %v88_v15 = vadd.f32 %v87_v14, %v86_v13 }
  0xba   :  { %111 = vpush %v88_v15 }
  0xeb   :  { %s112_s0 = spop %111 }
  0xec   :  { %91 = sst [smem:[#allocation8]] %s112_s0 }
  0xed   :  { %99 = dma.smem_to_hbm %s176_s1, 16, %s203_s2, [#allocation5]  }
  0xee   :  { %170 = dma.done.wait [#allocation5], 16  }
  0xef   :  { %171 = vsyncadd [#allocation5], 4294967280 }
  0xf0   :  { %103 = sfence }
  0xf1   :  { %104 = vsyncpa [#allocation4], 1 }
  0xf2   :  { %105 = vsyncpa [#allocation7], 1 }
  0xf3   :  { %106 = vsyncpa [#allocation5], 1 }

</bundles_post_ra>
